<compile_context>
chip_gen: v5e
topology: v5e:2x2
jax: 0.10.0
libtpu: 0.0.40
codegen_flags: <defaults>
</compile_context>

<pallas_src>
import jax
import jax.numpy as jnp
from jax.experimental import pallas as pl
from jax.experimental.pallas import tpu as pltpu


def _normalization_kernel(x_ref, mean_ref, inv_std_ref, o_ref):
    # x_ref, o_ref          : (row_tile, col_tile) blocks of the flattened image
    # mean_ref, inv_std_ref : (row_tile, 1) f32 per-row constants (broadcast over lanes)
    x = x_ref[...].astype(jnp.float32)
    o_ref[...] = ((x - mean_ref[...]) * inv_std_ref[...]).astype(o_ref.dtype)


def _pick_tiles(nc, hw):
    """Lane-dense, VMEM-friendly tile sizes for the flattened (nc, hw) view."""
    MAX_COL_TILE = 64 * 1024        # lane tile cap (multiple of 128)
    TARGET_BLOCK_ELEMS = 512 * 1024  # ~2 MiB of f32 per block

    col_tile = hw if hw <= MAX_COL_TILE else MAX_COL_TILE
    rows = max(1, TARGET_BLOCK_ELEMS // col_tile)
    if rows >= nc:
        row_tile = nc
    elif rows >= 8:
        row_tile = (rows // 8) * 8   # keep sublane dim a multiple of 8
    else:
        row_tile = rows
    return row_tile, col_tile


def normalization(img, mean, std):
    """(img - mean[:, None, None]) / std[:, None, None] for NCHW `img`."""
    N, C, H, W = img.shape
    mean = jnp.asarray(mean, dtype=jnp.float32).reshape(C)
    inv_std = 1.0 / jnp.asarray(std, dtype=jnp.float32).reshape(C)

    NC, HW = N * C, H * W
    x2d = img.reshape(NC, HW)                      # free metadata reshape (contiguous NCHW)
    mean_rows = jnp.tile(mean, N).reshape(NC, 1)   # row r -> channel r % C
    inv_rows = jnp.tile(inv_std, N).reshape(NC, 1)

    row_tile, col_tile = _pick_tiles(NC, HW)
    grid = (pl.cdiv(NC, row_tile), pl.cdiv(HW, col_tile))

    out2d = pl.pallas_call(
        _normalization_kernel,
        out_shape=jax.ShapeDtypeStruct((NC, HW), img.dtype),
        grid=grid,
        in_specs=[
            pl.BlockSpec((row_tile, col_tile), lambda i, j: (i, j)),
            pl.BlockSpec((row_tile, 1), lambda i, j: (i, 0)),
            pl.BlockSpec((row_tile, 1), lambda i, j: (i, 0)),
        ],
        out_specs=pl.BlockSpec((row_tile, col_tile), lambda i, j: (i, j)),
        compiler_params=pltpu.CompilerParams(
            dimension_semantics=("parallel", "parallel")
        ),
    )(x2d, mean_rows, inv_rows)

    return out2d.reshape(N, C, H, W)


def normalization_ref(img, mean, std):
    mean = jnp.asarray(mean, dtype=jnp.float32).reshape(-1, 1, 1)
    std = jnp.asarray(std, dtype=jnp.float32).reshape(-1, 1, 1)
    return ((img.astype(jnp.float32) - mean) / std).astype(img.dtype)


if __name__ == "__main__":
    key = jax.random.PRNGKey(0)
    N, C, H, W = 2, 3, 16, 16
    img = jax.random.uniform(key, (N, C, H, W), dtype=jnp.float32)

    # Deterministic "parameters" (standard ImageNet-style constants).
    mean = [0.485, 0.456, 0.406]
    std = [0.229, 0.224, 0.225]

    out = normalization(img, mean, std)
    out = jax.block_until_ready(out)

    ref = normalization_ref(img, mean, std)
    assert out.shape == (N, C, H, W)
    assert jnp.allclose(out, ref, atol=1e-5, rtol=1e-5)

    print("KERNEL_OK")
</pallas_src>

<mosaic_0001>
module attributes {stable_mosaic.version = 11 : i64} {
  func.func @_normalization_kernel(%arg0: i32, %arg1: i32, %arg2: memref<6x256xf32, #tpu.memory_space<vmem>>, %arg3: memref<6x1xf32, #tpu.memory_space<vmem>>, %arg4: memref<6x1xf32, #tpu.memory_space<vmem>>, %arg5: memref<6x256xf32, #tpu.memory_space<vmem>>) attributes {dimension_semantics = [#tpu.dimension_semantics<parallel>, #tpu.dimension_semantics<parallel>], iteration_bounds = array<i64: 1, 1>, scalar_prefetch = 0 : i64, scratch_operands = 0 : i64, tpu.core_type = #tpu.core_type<tc>, window_params = [{transform_indices = @transform_0, window_bounds = array<i64: 6, 256>}, {transform_indices = @transform_1, window_bounds = array<i64: 6, 1>}, {transform_indices = @transform_2, window_bounds = array<i64: 6, 1>}, {transform_indices = @transform_3, window_bounds = array<i64: 6, 256>}]} {
    %c0 = arith.constant 0 : index
    %c0_0 = arith.constant 0 : index
    %0 = vector.load %arg2[%c0, %c0_0] : memref<6x256xf32, #tpu.memory_space<vmem>>, vector<6x256xf32>
    %c0_1 = arith.constant 0 : index
    %c0_2 = arith.constant 0 : index
    %1 = vector.load %arg3[%c0_1, %c0_2] : memref<6x1xf32, #tpu.memory_space<vmem>>, vector<6x1xf32>
    %2 = vector.broadcast %1 : vector<6x1xf32> to vector<6x256xf32>
    %3 = arith.subf %0, %2 : vector<6x256xf32>
    %c0_3 = arith.constant 0 : index
    %c0_4 = arith.constant 0 : index
    %4 = vector.load %arg4[%c0_3, %c0_4] : memref<6x1xf32, #tpu.memory_space<vmem>>, vector<6x1xf32>
    %5 = vector.broadcast %4 : vector<6x1xf32> to vector<6x256xf32>
    %6 = arith.mulf %3, %5 : vector<6x256xf32>
    %c0_5 = arith.constant 0 : index
    %c0_6 = arith.constant 0 : index
    %7 = vector.load %arg5[%c0_5, %c0_6] : memref<6x256xf32, #tpu.memory_space<vmem>>, vector<6x256xf32>
    tpu.vector_store %arg5[%c0_5, %c0_6], %6 {strides = array<i32>} : memref<6x256xf32, #tpu.memory_space<vmem>>, vector<6x256xf32>,
    return
  }
  func.func @transform_0(%arg0: i32, %arg1: i32) -> (i32, i32) {
    %c0_i32 = arith.constant 0 : i32
    return %arg0, %arg1 : i32, i32
  }
  func.func @transform_1(%arg0: i32, %arg1: i32) -> (i32, i32) {
    %c0_i32 = arith.constant 0 : i32
    %c0_i32_0 = arith.constant 0 : i32
    return %arg0, %c0_i32 : i32, i32
  }
  func.func @transform_2(%arg0: i32, %arg1: i32) -> (i32, i32) {
    %c0_i32 = arith.constant 0 : i32
    %c0_i32_0 = arith.constant 0 : i32
    return %arg0, %c0_i32 : i32, i32
  }
  func.func @transform_3(%arg0: i32, %arg1: i32) -> (i32, i32) {
    %c0_i32 = arith.constant 0 : i32
    return %arg0, %arg1 : i32, i32
  }
}

</mosaic_0001>

<bundles_post_ra>
// kernel: tpu_custom_call.1
= control target key start
LH: loop header
LB: loop body
LE: loop exit
PB: predicated region body
PF: predicated region fallthrough
CT: control target
= control target key end

     0   :  { %v80_v1 = vmov 0   ;;  %s117_s0 = inlined_call_operand.vmem [shape: f32[6,256], index: 0, kind: input, shape index: {}]   ;;  %s118_s1 = inlined_call_operand.vmem [shape: f32[6,1], index: 1, kind: input, shape index: {}]   ;;  %s119_s2 = inlined_call_operand.vmem [shape: f32[6,1], index: 2, kind: input, shape index: {}]   ;;  %s120_s3 = inlined_call_operand.hbm [shape: f32[6,256], index: 3, kind: output, shape index: {}]  }
   0x1   :  { %v17_v0 = vld [vmem:[%s118_s1] sm:$0x3f]  ;;  %53 = vset.pattern.permute.xlu0 %v80_v1 }
   0x2   :  { %8 = vsyncpa [#allocation3], 0  ;;  %20 = vperm.xlu0 %53, %v17_v0   ;;  %v25_v2 = vld [vmem:[%s119_s2] sm:$0x3f]  ;;  %v16_v5 = vld [vmem:[%s117_s0 + $0x8] sm:$0x3f] }
   0x3   :  { %v15_v4 = vld [vmem:[%s117_s0] sm:$0x3f]  ;;  %s81_s1 = smov [#allocation2]   ;;  %s42_s23 = sshll.u32 %s120_s3, 4  ;;  %s43_s23 = int_to_ptr.hbm [resolvable:$true] %s42_s23 }
   0x4   :  { %s40_s20 = sshll.u32 %s81_s1, 4  ;;  %s41_s20 = int_to_ptr.vmem [resolvable:$true] %s40_s20 }
   0xa   :  { %28 = vperm.xlu0 %53, %v25_v2  }
  0x74   :  { %v21_v3 = vpop.permute.xlu0 %20 }
  0x75   :  { %v23_v6 = vsub.f32 %v15_v4, %v21_v3  ;;  %v24_v7 = vsub.f32 %v16_v5, %v21_v3 }
  0x7c   :  { %v29_v8 = vpop.permute.xlu0 %28 }
  0x7d   :  { %v31_v9 = vmul.f32 %v29_v8, %v23_v6  ;;  %v32_v10 = vmul.f32 %v29_v8, %v24_v7 }
  0x7f   :  { %33 = vst [vmem:[#allocation2] sm:$0x3f] %v31_v9 }
  0x80   :  { %34 = vst [vmem:[#allocation2 + $0x8] sm:$0x3f] %v32_v10 }
  0x81   :  { %45 = dma.vmem_to_hbm [thread:$0]  %s41_s20, 256, %s43_s23, [#allocation3]  }
  0x82   :  { %78 = dma.done.wait [#allocation3], 256  }
  0x83   :  { %79 = vsyncadd [#allocation3], 4294967040 }
  0x84   :  { %50 = vsyncpa [#allocation3], 1 }

</bundles_post_ra>
